<compile_context>
chip_gen: v7x
topology: tpu7x:2x2x1
jax: 0.10.0
libtpu: 0.0.40
codegen_flags: <defaults>
</compile_context>

<pallas_src>
import functools
from typing import NamedTuple, Optional

import jax
import jax.numpy as jnp
from jax.experimental import pallas as pl
from jax.experimental.pallas import tpu as pltpu


def _round_up(x, m):
    return (x + m - 1) // m * m


def _device_kind():
    try:
        return jax.devices()[0].device_kind.lower()
    except Exception:
        return ""


def _is_v7x():
    return "v7" in _device_kind()


# --------------------------------------------------------------------------
# Kernel
# --------------------------------------------------------------------------
def _gcn_mean_kernel(kidx_ref, kcount_ref, adj_ref, rhs_ref, ego_ref, scale_ref,
                     out_ref, *, num_layers, tile_k, rhs_resident):
    """One (row-tile, k-slot) step of ego*c0 + (adj@ego)*scale*c1.

    kidx_ref   : (nbm, kmax) int32 SMEM — compacted nonzero k-block indices
    kcount_ref : (nbm,)      int32 SMEM — #nonzero k-blocks per row tile
    adj_ref    : (TM, TK)    int8/bf16  — adjacency block (block kidx[i, k])
    rhs_ref    : (n_k, Dp) or (TK, Dp) bf16 — resident table or streamed block
    ego_ref    : (TM, Dp)    bf16 — layer-0 term, resident across k
    scale_ref  : (TM, 1)     f32  — per-row dequant scale, resident across k
    out_ref    : (TM, Dp)    f32  — output row tile, doubles as accumulator
    """
    i = pl.program_id(0)
    k = pl.program_id(1)

    @pl.when(k == 0)
    def _():
        out_ref[...] = jnp.zeros_like(out_ref)

    # Block-sparse skip: only multiply when this k-slot maps to a nonzero
    # adjacency block for row-tile i.  Padded slots repeat the previous block
    # index, so their DMA is skipped as well.
    @pl.when(k < kcount_ref[i])
    def _():
        a = adj_ref[...].astype(jnp.bfloat16)       # VPU dequant-to-bf16 cast
        if rhs_resident:
            off = pl.multiple_of(kidx_ref[i, k] * tile_k, 128)
            b = rhs_ref[pl.ds(off, tile_k), :]
        else:
            b = rhs_ref[...]
        out_ref[...] += jnp.dot(a, b, preferred_element_type=jnp.float32)

    @pl.when(k == pl.num_programs(1) - 1)
    def _():
        # mean([ego, side, ..., side]) == ego*c0 + side*c1  (L copies of side)
        c0 = jnp.float32(1.0 / (num_layers + 1))
        c1 = jnp.float32(num_layers / (num_layers + 1))
        out_ref[...] = (ego_ref[...].astype(jnp.float32) * c0
                        + out_ref[...] * (scale_ref[...] * c1))


# --------------------------------------------------------------------------
# One-time graph preparation (amortized across forward calls)
# --------------------------------------------------------------------------
class PreparedGraph(NamedTuple):
    adj_q: jax.Array       # (n_m, n_k)  int8 (or bf16) padded adjacency
    row_scale: jax.Array   # (n_m, 1)    f32 per-row dequant scale
    kidx: jax.Array        # (nbm, kmax) int32 nonzero-block table
    kcount: jax.Array      # (nbm,)      int32 nonzero-block counts
    n: int
    tile_m: int
    tile_k: int
    kmax: int


def prepare_adjacency(adj, *, tile_m=None, tile_k=None, adj_dtype=jnp.int8):
    """Pad + quantize the adjacency and build block-sparsity metadata once.

    Requires a concrete (non-traced) adjacency — this is preprocessing,
    analogous to building a sparse storage format.
    """
    n = adj.shape[0]
    assert adj.shape == (n, n)

    if tile_m is None:
        tile_m = 512
        if _is_v7x():
            # keep nbm >= 2 when possible so both TensorCores get work
            tile_m = min(tile_m, max(256, _round_up(-(-n // 2), 128)))
    if tile_k is None:
        tile_k = 2048
    tile_m = min(tile_m, _round_up(n, 128))
    tile_k = min(tile_k, _round_up(n, 128))

    n_m = _round_up(n, tile_m)
    n_k = _round_up(n, tile_k)
    nbm, nbk = n_m // tile_m, n_k // tile_k

    adj = adj.astype(jnp.float32)
    if jnp.issubdtype(adj_dtype, jnp.integer):
        qmax = float(jnp.iinfo(adj_dtype).max)               # 127 for int8
        absmax = jnp.max(jnp.abs(adj), axis=1)
        scale = jnp.where(absmax > 0, absmax / qmax, 1.0).astype(jnp.float32)
        q = jnp.clip(jnp.round(adj / scale[:, None]), -qmax, qmax).astype(adj_dtype)
    else:
        scale = jnp.ones((n,), jnp.float32)
        q = adj.astype(adj_dtype)

    # Pad + cast in one step (no intermediate padded f32 copy).
    adj_q = jnp.zeros((n_m, n_k), adj_dtype).at[:n, :n].set(q)
    row_scale = jnp.zeros((n_m, 1), jnp.float32).at[:n, 0].set(scale)

    # Block-sparsity metadata computed on the actually-streamed operand.
    blk_nz = jnp.any(adj_q.reshape(nbm, tile_m, nbk, tile_k) != 0, axis=(1, 3))
    kcount = jnp.sum(blk_nz, axis=1).astype(jnp.int32)          # (nbm,)
    order = jnp.argsort(jnp.logical_not(blk_nz), axis=1, stable=True)
    last_nz = jnp.where(kcount > 0,
                        order[jnp.arange(nbm), jnp.maximum(kcount - 1, 0)], 0)
    kidx = jnp.where(jnp.arange(nbk)[None, :] < kcount[:, None],
                     order, last_nz[:, None]).astype(jnp.int32)

    # Size the k grid by the densest row tile — no no-op grid iterations.
    kmax = max(int(jnp.max(kcount)), 1)
    kidx = kidx[:, :kmax]

    return PreparedGraph(adj_q, row_scale, kidx, kcount, n, tile_m, tile_k, kmax)


# --------------------------------------------------------------------------
# Propagation: (ego + L * adj@ego) / (L+1)
# --------------------------------------------------------------------------
def gcn_mean_prepared(prep: PreparedGraph, emb, *, num_layers,
                      compute_dtype=jnp.bfloat16, lane=128):
    n, d = emb.shape
    assert n == prep.n
    tile_m, tile_k, kmax = prep.tile_m, prep.tile_k, prep.kmax
    n_m, n_k = prep.adj_q.shape
    nbm = n_m // tile_m

    d_pad = _round_up(d, lane)          # lane-dense output -> unmasked stores

    emb_bf = emb.astype(compute_dtype)
    emb_rhs = jnp.zeros((n_k, d_pad), compute_dtype).at[:n, :d].set(emb_bf)
    ego_p = jnp.zeros((n_m, d_pad), compute_dtype).at[:n, :d].set(emb_bf)

    # Per-generation VMEM budgets: keep the whole RHS table resident when it
    # is cheap (v5e/v6e: 128 MiB physical; v7x: 64 MiB -> smaller budget).
    if _is_v7x():
        vmem_limit = 32 * 1024 * 1024
        rhs_budget = 16 * 1024 * 1024
    else:
        vmem_limit = 64 * 1024 * 1024
        rhs_budget = 48 * 1024 * 1024
    rhs_bytes = n_k * d_pad * jnp.dtype(compute_dtype).itemsize
    rhs_resident = 2 * rhs_bytes <= rhs_budget   # 2x: conservative double-buffer

    if rhs_resident:
        rhs_spec = pl.BlockSpec((n_k, d_pad), lambda i, k, kidx, kcount: (0, 0))
    else:
        rhs_spec = pl.BlockSpec((tile_k, d_pad),
                                lambda i, k, kidx, kcount: (kidx[i, k], 0))

    kernel = functools.partial(_gcn_mean_kernel, num_layers=num_layers,
                               tile_k=tile_k, rhs_resident=rhs_resident)

    adj_itemsize = jnp.dtype(prep.adj_q.dtype).itemsize
    out = pl.pallas_call(
        kernel,
        out_shape=jax.ShapeDtypeStruct((n_m, d_pad), jnp.float32),
        grid_spec=pltpu.PrefetchScalarGridSpec(
            num_scalar_prefetch=2,
            grid=(nbm, kmax),
            in_specs=[
                # adjacency (TM, TK) block, gathered via the prefetched table
                pl.BlockSpec((tile_m, tile_k),
                             lambda i, k, kidx, kcount: (i, kidx[i, k])),
                # matmul RHS: resident table or streamed (TK, Dp) block
                rhs_spec,
                # layer-0 ego row tile (bf16, resident across k)
                pl.BlockSpec((tile_m, d_pad),
                             lambda i, k, kidx, kcount: (i, 0)),
                # per-row dequant scale (resident across k)
                pl.BlockSpec((tile_m, 1),
                             lambda i, k, kidx, kcount: (i, 0)),
            ],
            out_specs=pl.BlockSpec((tile_m, d_pad),
                                   lambda i, k, kidx, kcount: (i, 0)),
        ),
        compiler_params=pltpu.CompilerParams(
            dimension_semantics=("parallel", "arbitrary"),
            vmem_limit_bytes=vmem_limit,
        ),
        cost_estimate=pl.CostEstimate(
            flops=2 * n * n * d_pad,
            transcendentals=0,
            bytes_accessed=(n_m * n_k * adj_itemsize              # adjacency
                            + rhs_bytes * (1 if rhs_resident else max(1, nbm))
                            + n_m * d_pad * 2                     # ego (bf16)
                            + n_m * d_pad * 4),                   # output (f32)
        ),
    )(prep.kidx, prep.kcount, prep.adj_q, emb_rhs, ego_p, prep.row_scale)

    return out[:n, :d].astype(emb.dtype)


def gcn_mean(adj, emb, *, num_layers, tile_m=None, tile_k=None,
             adj_dtype=jnp.int8):
    prep = prepare_adjacency(adj, tile_m=tile_m, tile_k=tile_k,
                             adj_dtype=adj_dtype)
    return gcn_mean_prepared(prep, emb, num_layers=num_layers)


# --------------------------------------------------------------------------
# BiGN forward
# --------------------------------------------------------------------------
def xavier_uniform(key, shape, dtype=jnp.float32):
    fan_in, fan_out = shape[0], shape[1]
    limit = jnp.sqrt(6.0 / (fan_in + fan_out))
    return jax.random.uniform(key, shape, dtype, minval=-limit, maxval=limit)


def bign_forward(user_adj, item_adj, user_emb, item_emb,
                 users, pos_items, neg_items, *, num_layers,
                 user_prep: Optional[PreparedGraph] = None,
                 item_prep: Optional[PreparedGraph] = None):
    """Equivalent of BiGN.forward.  Pass prepared graphs to amortize the
    adjacency padding/quantization/metadata across calls."""
    if user_prep is None:
        user_prep = prepare_adjacency(user_adj)
    if item_prep is None:
        item_prep = prepare_adjacency(item_adj)
    u_g = gcn_mean_prepared(user_prep, user_emb, num_layers=num_layers)
    i_g = gcn_mean_prepared(item_prep, item_emb, num_layers=num_layers)
    # Row gather by index = glue (plain JAX).
    return u_g[users, :], i_g[pos_items, :], i_g[neg_items, :]


def _reference(user_adj, item_adj, user_emb, item_emb,
               users, pos_items, neg_items, num_layers):
    """Pure-JAX f32 reference mirroring the torch code exactly."""
    def prop(adj, ego):
        alls = [ego]
        for _ in range(num_layers):
            alls.append(jnp.dot(adj, ego, precision=jax.lax.Precision.HIGHEST))
        return jnp.mean(jnp.stack(alls, axis=1), axis=1)

    u_g = prop(user_adj, user_emb)
    i_g = prop(item_adj, item_emb)
    return u_g[users, :], i_g[pos_items, :], i_g[neg_items, :]


if __name__ == "__main__":
    key = jax.random.PRNGKey(0)
    n_user, n_item, emb_size = 64, 96, 32
    num_layers = 3          # i.e. args.layer_size = '[64, 64, 64]'
    batch = 8

    k_ue, k_ie, k_ua, k_ia, k_u, k_p, k_n = jax.random.split(key, 7)

    # Xavier-initialized embedding tables (as in BiGN.__init__).
    user_emb = xavier_uniform(k_ue, (n_user, emb_size))
    item_emb = xavier_uniform(k_ie, (n_item, emb_size))

    # Deterministic synthetic (dense) normalized adjacency matrices standing in
    # for sparse_user_adj / sparse_item_adj (~10% density).
    def make_adj(k, n):
        a = (jax.random.uniform(k, (n, n)) < 0.1).astype(jnp.float32)
        deg = jnp.maximum(a.sum(axis=1, keepdims=True), 1.0)
        return a / deg

    user_adj = make_adj(k_ua, n_user)
    item_adj = make_adj(k_ia, n_item)

    users = jax.random.randint(k_u, (batch,), 0, n_user)
    pos_items = jax.random.randint(k_p, (batch,), 0, n_item)
    neg_items = jax.random.randint(k_n, (batch,), 0, n_item)

    # One-time graph preparation (amortized in a training loop).
    user_prep = prepare_adjacency(user_adj)
    item_prep = prepare_adjacency(item_adj)

    u_e, p_e, n_e = bign_forward(user_adj, item_adj, user_emb, item_emb,
                                 users, pos_items, neg_items,
                                 num_layers=num_layers,
                                 user_prep=user_prep, item_prep=item_prep)
    jax.block_until_ready((u_e, p_e, n_e))

    # Correctness check against a pure-JAX f32 reference.  The kernel streams
    # the adjacency as per-row-scaled int8 and the RHS/ego in bf16 (f32
    # accumulation), so tolerance is loosened accordingly.
    u_r, p_r, n_r = _reference(user_adj, item_adj, user_emb, item_emb,
                               users, pos_items, neg_items, num_layers)
    assert u_e.shape == (batch, emb_size)
    assert p_e.shape == (batch, emb_size)
    assert n_e.shape == (batch, emb_size)
    assert jnp.allclose(u_e, u_r, atol=1e-2, rtol=1e-2)
    assert jnp.allclose(p_e, p_r, atol=1e-2, rtol=1e-2)
    assert jnp.allclose(n_e, n_r, atol=1e-2, rtol=1e-2)

    print("KERNEL_OK")
</pallas_src>

<mosaic_0001>
module attributes {stable_mosaic.version = 11 : i64} {
  func.func @_gcn_mean_kernel(%arg0: i32, %arg1: i32, %arg2: memref<1x1xi32, #tpu.memory_space<smem>>, %arg3: memref<1xi32, #tpu.memory_space<smem>>, %arg4: memref<128x128xi8, #tpu.memory_space<vmem>>, %arg5: memref<128x128xbf16, #tpu.memory_space<vmem>>, %arg6: memref<128x128xbf16, #tpu.memory_space<vmem>>, %arg7: memref<128x1xf32, #tpu.memory_space<vmem>>, %arg8: memref<128x128xf32, #tpu.memory_space<vmem>>) attributes {dimension_semantics = [#tpu.dimension_semantics<parallel>, #tpu.dimension_semantics<arbitrary>], iteration_bounds = array<i64: 1, 1>, scalar_prefetch = 2 : i64, scratch_operands = 0 : i64, tpu.core_type = #tpu.core_type<tc>, window_params = [{transform_indices = @transform_0, window_bounds = array<i64: 128, 128>}, {pipeline_mode = #tpu.pipeline_mode<synchronous>, transform_indices = @transform_1, window_bounds = array<i64: 128, 128>}, {transform_indices = @transform_2, window_bounds = array<i64: 128, 128>}, {transform_indices = @transform_3, window_bounds = array<i64: 128, 1>}, {transform_indices = @transform_4, window_bounds = array<i64: 128, 128>}]} {
    %c0_i32 = arith.constant 0 : i32
    %0 = arith.cmpi eq, %arg1, %c0_i32 : i32
    %1 = arith.extui %0 : i1 to i32
    %c0_i32_0 = arith.constant 0 : i32
    %2 = arith.cmpi ne, %1, %c0_i32_0 : i32
    scf.if %2 {
      %cst = arith.constant 0.000000e+00 : f32
      %11 = vector.broadcast %cst : f32 to vector<128x128xf32>
      %c0 = arith.constant 0 : index
      %c0_4 = arith.constant 0 : index
      %12 = vector.load %arg8[%c0, %c0_4] : memref<128x128xf32, #tpu.memory_space<vmem>>, vector<128x128xf32>
      tpu.vector_store %arg8[%c0, %c0_4], %11 {strides = array<i32>} : memref<128x128xf32, #tpu.memory_space<vmem>>, vector<128x128xf32>,
    } else {
    }
    %3 = arith.index_cast %arg0 : i32 to index
    %4 = memref.load %arg3[%3] : memref<1xi32, #tpu.memory_space<smem>>
    %5 = arith.cmpi slt, %arg1, %4 : i32
    %6 = arith.extui %5 : i1 to i32
    %c0_i32_1 = arith.constant 0 : i32
    %7 = arith.cmpi ne, %6, %c0_i32_1 : i32
    scf.if %7 {
      %c0 = arith.constant 0 : index
      %c0_4 = arith.constant 0 : index
      %11 = vector.load %arg4[%c0, %c0_4] : memref<128x128xi8, #tpu.memory_space<vmem>>, vector<128x128xi8>
      %12 = arith.sitofp %11 : vector<128x128xi8> to vector<128x128xbf16>
      %13 = arith.index_cast %arg0 : i32 to index
      %14 = arith.index_cast %arg1 : i32 to index
      %15 = memref.load %arg2[%13, %14] : memref<1x1xi32, #tpu.memory_space<smem>>
      %c128_i32 = arith.constant 128 : i32
      %16 = arith.muli %15, %c128_i32 : i32
      %17 = tpu.assume_multiple %16, 128 : i32
      %18 = arith.index_cast %17 : i32 to index
      %c0_5 = arith.constant 0 : index
      %19 = vector.load %arg5[%18, %c0_5] : memref<128x128xbf16, #tpu.memory_space<vmem>>, vector<128x128xbf16>
      %c0_6 = arith.constant 0 : index
      %c0_7 = arith.constant 0 : index
      %20 = vector.load %arg8[%c0_6, %c0_7] : memref<128x128xf32, #tpu.memory_space<vmem>>, vector<128x128xf32>
      %cst = arith.constant dense<0.000000e+00> : vector<128x128xf32>
      %21 = tpu.matmul %12, %19, %cst {dimension_numbers = #tpu.dot_dimension_numbers<[1], [0], [0], [1], [0, 0, 1, 1], [], []>} : vector<128x128xbf16>, vector<128x128xbf16>, vector<128x128xf32> -> vector<128x128xf32>
      %22 = arith.addf %20, %21 : vector<128x128xf32>
      %c0_8 = arith.constant 0 : index
      %c0_9 = arith.constant 0 : index
      %23 = vector.load %arg8[%c0_8, %c0_9] : memref<128x128xf32, #tpu.memory_space<vmem>>, vector<128x128xf32>
      tpu.vector_store %arg8[%c0_8, %c0_9], %22 {strides = array<i32>} : memref<128x128xf32, #tpu.memory_space<vmem>>, vector<128x128xf32>,
    } else {
    }
    %c0_i32_2 = arith.constant 0 : i32
    %8 = arith.cmpi eq, %arg1, %c0_i32_2 : i32
    %9 = arith.extui %8 : i1 to i32
    %c0_i32_3 = arith.constant 0 : i32
    %10 = arith.cmpi ne, %9, %c0_i32_3 : i32
    scf.if %10 {
      %c0 = arith.constant 0 : index
      %c0_4 = arith.constant 0 : index
      %11 = vector.load %arg6[%c0, %c0_4] : memref<128x128xbf16, #tpu.memory_space<vmem>>, vector<128x128xbf16>
      %12 = arith.extf %11 : vector<128x128xbf16> to vector<128x128xf32>
      %cst = arith.constant 2.500000e-01 : f32
      %13 = vector.broadcast %cst : f32 to vector<128x128xf32>
      %14 = arith.mulf %12, %13 : vector<128x128xf32>
      %c0_5 = arith.constant 0 : index
      %c0_6 = arith.constant 0 : index
      %15 = vector.load %arg8[%c0_5, %c0_6] : memref<128x128xf32, #tpu.memory_space<vmem>>, vector<128x128xf32>
      %c0_7 = arith.constant 0 : index
      %c0_8 = arith.constant 0 : index
      %16 = vector.load %arg7[%c0_7, %c0_8] : memref<128x1xf32, #tpu.memory_space<vmem>>, vector<128x1xf32>
      %cst_9 = arith.constant 7.500000e-01 : f32
      %17 = vector.broadcast %cst_9 : f32 to vector<128x1xf32>
      %18 = arith.mulf %16, %17 : vector<128x1xf32>
      %19 = vector.broadcast %18 : vector<128x1xf32> to vector<128x128xf32>
      %20 = arith.mulf %15, %19 : vector<128x128xf32>
      %21 = arith.addf %14, %20 : vector<128x128xf32>
      %c0_10 = arith.constant 0 : index
      %c0_11 = arith.constant 0 : index
      %22 = vector.load %arg8[%c0_10, %c0_11] : memref<128x128xf32, #tpu.memory_space<vmem>>, vector<128x128xf32>
      tpu.vector_store %arg8[%c0_10, %c0_11], %21 {strides = array<i32>} : memref<128x128xf32, #tpu.memory_space<vmem>>, vector<128x128xf32>,
    } else {
    }
    return
  }
  func.func @transform_0(%arg0: i32, %arg1: i32, %arg2: memref<1x1xi32, #tpu.memory_space<smem>>, %arg3: memref<1xi32, #tpu.memory_space<smem>>) -> (i32, i32) {
    %0 = arith.index_cast %arg0 : i32 to index
    %1 = arith.index_cast %arg1 : i32 to index
    %2 = memref.load %arg2[%0, %1] : memref<1x1xi32, #tpu.memory_space<smem>>
    %c0_i32 = arith.constant 0 : i32
    return %arg0, %2 : i32, i32
  }
  func.func @transform_1(%arg0: i32, %arg1: i32, %arg2: memref<1x1xi32, #tpu.memory_space<smem>>, %arg3: memref<1xi32, #tpu.memory_space<smem>>) -> (i32, i32) {
    %c0_i32 = arith.constant 0 : i32
    %c0_i32_0 = arith.constant 0 : i32
    %c0_i32_1 = arith.constant 0 : i32
    return %c0_i32, %c0_i32_0 : i32, i32
  }
  func.func @transform_2(%arg0: i32, %arg1: i32, %arg2: memref<1x1xi32, #tpu.memory_space<smem>>, %arg3: memref<1xi32, #tpu.memory_space<smem>>) -> (i32, i32) {
    %c0_i32 = arith.constant 0 : i32
    %c0_i32_0 = arith.constant 0 : i32
    return %arg0, %c0_i32 : i32, i32
  }
  func.func @transform_3(%arg0: i32, %arg1: i32, %arg2: memref<1x1xi32, #tpu.memory_space<smem>>, %arg3: memref<1xi32, #tpu.memory_space<smem>>) -> (i32, i32) {
    %c0_i32 = arith.constant 0 : i32
    %c0_i32_0 = arith.constant 0 : i32
    return %arg0, %c0_i32 : i32, i32
  }
  func.func @transform_4(%arg0: i32, %arg1: i32, %arg2: memref<1x1xi32, #tpu.memory_space<smem>>, %arg3: memref<1xi32, #tpu.memory_space<smem>>) -> (i32, i32) {
    %c0_i32 = arith.constant 0 : i32
    %c0_i32_0 = arith.constant 0 : i32
    return %arg0, %c0_i32 : i32, i32
  }
}

</mosaic_0001>

<bundles_post_ra>
// kernel: tpu_custom_call.1
= control target key start
LH: loop header
LB: loop body
LE: loop exit
PB: predicated region body
PF: predicated region fallthrough
CT: control target
= control target key end

     0   :  { %s1001_s0 = inlined_call_operand.<no memory space> [shape: s32[1,1], index: 0, kind: input, shape index: {}]   ;;  %s1002_s1 = inlined_call_operand.<no memory space> [shape: s32[1], index: 1, kind: input, shape index: {}]   ;;  %s1003_s2 = inlined_call_operand.hbm [shape: s8[128,128], index: 2, kind: input, shape index: {}]   ;;  %s1004_s3 = inlined_call_operand.hbm [shape: bf16[128,128], index: 3, kind: input, shape index: {}]   ;;  %s1005_s4 = inlined_call_operand.hbm [shape: bf16[128,128], index: 4, kind: input, shape index: {}]   ;;  %s1006_s5 = inlined_call_operand.hbm [shape: f32[128,1], index: 5, kind: input, shape index: {}]   ;;  %s1007_s6 = inlined_call_operand.hbm [shape: f32[128,128], index: 6, kind: output, shape index: {}]  }
   0x1   :  { %11 = sst [smem:[#allocation3]] %s1001_s0 }
   0x2   :  { %13 = vsyncpa [#allocation6], 0 }
   0x3   :  { %14 = vsyncpa [#allocation9], 0 }
   0x4   :  { %15 = vsyncpa [#allocation12], 0 }
   0x5   :  { %16 = vsyncpa [#allocation7], 0  ;;  %s850_s23 = smov [#allocation8]   ;;  %s22_s25 = sld [smem:[#allocation3]] }
   0x6   :  { %s40_s24 = sshll.u32 %s850_s23, 4  ;;  %s730_s28 = scalar_lea.hbm %s1004_s3, 1024  ;;  %s41_s24 = int_to_ptr.vmem [resolvable:$true] %s40_s24 }
   0x7   :  { %p731_p0 = scmp.ne.s32.totalorder %s1004_s3, %s730_s28  ;;  %p734_p1 = scmp.lt.u32.totalorder %s730_s28, %s1004_s3 }
   0x9   :  { %p736_p2 = pnand %p734_p1, %p731_p0 }
   0xb   :  { %739 = shalt.err (!%p736_p2)
}
   0xc   :  { %s740_s0 = scalar_lea.vmem %s41_s24, 1024  ;;  %p745_p4 = scmp.lt.s32.totalorder %s41_s24, %s41_s24 }
   0xd   :  { %p741_p3 = scmp.ne.s32.totalorder %s41_s24, %s740_s0  ;;  %p746_p5 = scmp.lt.s32.totalorder %s740_s0, %s740_s0 }
   0xf   :  { %p747_p6 = por %p746_p5, %p745_p4 }
  0x11   :  { %p748_p7 = pnand %p747_p6, %p741_p3 }
  0x13   :  { %751 = shalt.err (!%p748_p7)
}
  0x14   :  { %s851_s9 = smov 64   ;;  %s852_s10 = smov 4  }
  0x15   :  { %46 = dma.hbm_to_vmem [thread:$0]  %s1004_s3, 1024, %s41_s24, [#allocation9], %s851_s9, %s851_s9, %s852_s10  }
  0x16   :  { %s853_s13 = smov [#allocation5]   ;;  %s854_s15 = smov [#allocation10]  }
  0x17   :  { %s28_s14 = sshll.u32 %s853_s13, 4  ;;  %s52_s16 = sshll.u32 %s854_s15, 4  ;;  %s914_s14 = int_to_ptr.vmem [resolvable:$true] %s28_s14  ;;  %s916_s16 = int_to_ptr.vmem [resolvable:$true] %s52_s16 }
  0x18   :  { %s593_s17 = sshll.u32 %s22_s25, 7  ;;  %s855_s21 = smov [#allocation11]  }
  0x19   :  { %s27_s20 = scalar_lea.hbm %s1003_s2, %s593_s17  ;;  %s921_s22 = sshll.u32 %s855_s21, 4  ;;  %s65_s22 = int_to_ptr.vmem [resolvable:$true] %s921_s22 }
  0x1a   :  { %s752_s23 = scalar_lea.hbm %s27_s20, 512  ;;  %s754_s24 = scalar_lea.hbm %s1003_s2, 512 }
  0x1b   :  { %p753_p8 = scmp.ne.s32.totalorder %s27_s20, %s752_s23  ;;  %p755_p9 = scmp.lt.u32.totalorder %s27_s20, %s1003_s2 }
  0x1c   :  { %p756_p10 = scmp.lt.u32.totalorder %s754_s24, %s752_s23  ;;  %p758_p12 = scmp.lt.u32.totalorder %s752_s23, %s27_s20 }
  0x1e   :  { %p757_p11 = por %p756_p10, %p755_p9 }
  0x20   :  { %p759_p13 = por %p758_p12, %p757_p11 }
  0x22   :  { %p760_p0 = pnand %p759_p13, %p753_p8 }
  0x24   :  { %763 = shalt.err (!%p760_p0)
}
  0x25   :  { %s764_s25 = scalar_lea.vmem %s914_s14, 512  ;;  %p769_p2 = scmp.lt.s32.totalorder %s914_s14, %s914_s14 }
  0x26   :  { %p765_p1 = scmp.ne.s32.totalorder %s914_s14, %s764_s25  ;;  %p770_p3 = scmp.lt.s32.totalorder %s764_s25, %s764_s25 }
  0x28   :  { %p771_p4 = por %p770_p3, %p769_p2 }
  0x2a   :  { %p772_p5 = pnand %p771_p4, %p765_p1 }
  0x2c   :  { %775 = shalt.err (!%p772_p5)
}
  0x2d   :  { %s856_s29 = smov 128   ;;  %s857_s2 = smov 8  }
  0x2e   :  { %34 = dma.hbm_to_vmem [thread:$0]  %s27_s20, 512, %s914_s14, [#allocation6], %s856_s29, %s856_s29, %s857_s2  }
  0x2f   :  { %s776_s8 = scalar_lea.hbm %s1005_s4, 1024 }
  0x30   :  { %p777_p6 = scmp.ne.s32.totalorder %s1005_s4, %s776_s8  ;;  %p780_p7 = scmp.lt.u32.totalorder %s776_s8, %s1005_s4 }
  0x32   :  { %p782_p8 = pnand %p780_p7, %p777_p6 }
  0x34   :  { %785 = shalt.err (!%p782_p8)
}
  0x35   :  { %s786_s15 = scalar_lea.vmem %s916_s16, 1024  ;;  %p791_p10 = scmp.lt.s32.totalorder %s916_s16, %s916_s16 }
  0x36   :  { %p787_p9 = scmp.ne.s32.totalorder %s916_s16, %s786_s15  ;;  %p792_p11 = scmp.lt.s32.totalorder %s786_s15, %s786_s15 }
  0x38   :  { %p793_p12 = por %p792_p11, %p791_p10 }
  0x3a   :  { %p794_p13 = pnand %p793_p12, %p787_p9 }
  0x3c   :  { %797 = shalt.err (!%p794_p13)
}
  0x3d   :  { %58 = dma.hbm_to_vmem [thread:$0]  %s1005_s4, 1024, %s916_s16, [#allocation9], %s851_s9, %s851_s9, %s852_s10  }
  0x3e   :  { %s798_s20 = scalar_lea.hbm %s1006_s5, 2048 }
  0x3f   :  { %p799_p0 = scmp.ne.s32.totalorder %s1006_s5, %s798_s20  ;;  %p802_p1 = scmp.lt.u32.totalorder %s798_s20, %s1006_s5 }
  0x41   :  { %p804_p2 = pnand %p802_p1, %p799_p0 }
  0x43   :  { %807 = shalt.err (!%p804_p2)
}
  0x44   :  { %s808_s24 = scalar_lea.vmem %s65_s22, 2048  ;;  %p813_p4 = scmp.lt.s32.totalorder %s65_s22, %s65_s22 }
  0x45   :  { %p809_p3 = scmp.ne.s32.totalorder %s65_s22, %s808_s24  ;;  %p814_p5 = scmp.lt.s32.totalorder %s808_s24, %s808_s24 }
  0x47   :  { %p815_p6 = por %p814_p5, %p813_p4 }
  0x49   :  { %p816_p7 = pnand %p815_p6, %p809_p3 }
  0x4b   :  { %819 = shalt.err (!%p816_p7)
}
  0x4c   :  { %70 = dma.hbm_to_vmem [thread:$0]  %s1006_s5, 2048, %s65_s22, [#allocation12], %s856_s29, %s856_s29, %s857_s2  }
  0x4d   :  { %842 = dma.done.wait [#allocation6], 512  }
  0x4e   :  { %843 = vsyncadd [#allocation6], 4294966784 }
  0x4f   :  { %844 = dma.done.wait [#allocation9], 2048  }
  0x50   :  { %845 = vsyncadd [#allocation9], 4294965248 }
  0x51   :  { %846 = dma.done.wait [#allocation12], 2048  }
  0x52   :  { %847 = vsyncadd [#allocation12], 4294965248  ;;  %v858_v0 = vmov 0.0   ;;  %p595_p8 = scmp.le.s32.totalorder %s1002_s1, 0 }
  0x53   :  { %92 = vst [vmem:[#allocation13] sm:$0xff] %v858_v0  ;;  %93 = vst [vmem:[#allocation13 + $0x8] sm:$0xff] %v858_v0  ;;  %s128_s16 = sld [smem:[#allocation3]] (!%p595_p8)  ;;  %v113_v1 = vld [vmem:[#allocation5] sm:$0xff] (!%p595_p8)  ;;  %v115_v2 = vld [vmem:[#allocation5 + $0x10] sm:$0xff] (!%p595_p8) }
  0x54   :  { %94 = vst [vmem:[#allocation13 + $0x10] sm:$0xff] %v858_v0  ;;  %95 = vst [vmem:[#allocation13 + $0x18] sm:$0xff] %v858_v0  ;;  %112 = sbr.rel (%p595_p8) target bundleno = 352 (0x160), region = 41  ;;  %v117_v3 = vunpack.c.l.s8.bf16 (!%p595_p8), %v113_v1  ;;  %v121_v4 = vunpack.c.l.s8.bf16 (!%p595_p8), %v115_v2  ;;  %v114_v13 = vld [vmem:[#allocation5 + $0x8] sm:$0xff] (!%p595_p8)  ;;  %v116_v14 = vld [vmem:[#allocation5 + $0x18] sm:$0xff] (!%p595_p8)  ;;  %v118_v15 = vunpack.c.h.s8.bf16 (!%p595_p8), %v113_v1  ;;  %v122_v16 = vunpack.c.h.s8.bf16 (!%p595_p8), %v115_v2 }
  0x55   :  { %96 = vst [vmem:[#allocation13 + $0x20] sm:$0xff] %v858_v0  ;;  %97 = vst [vmem:[#allocation13 + $0x28] sm:$0xff] %v858_v0  ;;  %v119_v17 = vunpack.c.l.s8.bf16 (!%p595_p8), %v114_v13  ;;  %v123_v18 = vunpack.c.l.s8.bf16 (!%p595_p8), %v116_v14  ;;  %v120_v19 = vunpack.c.h.s8.bf16 (!%p595_p8), %v114_v13  ;;  %v124_v20 = vunpack.c.h.s8.bf16 (!%p595_p8), %v116_v14 }
  0x56   :  { %98 = vst [vmem:[#allocation13 + $0x30] sm:$0xff] %v858_v0  ;;  %99 = vst [vmem:[#allocation13 + $0x38] sm:$0xff] %v858_v0  ;;  %677 = vmatprep.mubr.bf16.mxu0 (!%p595_p8), %v117_v3  ;;  %685 = vmatprep.mubr.bf16.mxu1 (!%p595_p8), %v121_v4 }
  0x57   :  { %100 = vst [vmem:[#allocation13 + $0x40] sm:$0xff] %v858_v0  ;;  %101 = vst [vmem:[#allocation13 + $0x48] sm:$0xff] %v858_v0 }
  0x58   :  { %102 = vst [vmem:[#allocation13 + $0x50] sm:$0xff] %v858_v0  ;;  %103 = vst [vmem:[#allocation13 + $0x58] sm:$0xff] %v858_v0 }
  0x59   :  { %104 = vst [vmem:[#allocation13 + $0x60] sm:$0xff] %v858_v0  ;;  %105 = vst [vmem:[#allocation13 + $0x68] sm:$0xff] %v858_v0  ;;  %s596_s22 = sshll.u32 (!%p595_p8), %s128_s16, 7 }
  0x5a   :  { %106 = vst [vmem:[#allocation13 + $0x70] sm:$0xff] %v858_v0  ;;  %107 = vst [vmem:[#allocation13 + $0x78] sm:$0xff] %v858_v0  ;;  %s130_s27 = sshra.s32 (!%p595_p8), %s596_s22, 3  ;;  %v150_v23 = vld [vmem:[#allocation13] sm:$0xff] (!%p595_p8)  ;;  %v151_v33 = vld [vmem:[#allocation13 + $0x8] sm:$0xff] (!%p595_p8) }
  0x5b   :  { %s597_s28 = sshll.u32 %s130_s27, 2  ;;  %v152_v21 = vld [vmem:[#allocation13 + $0x10] sm:$0xff]  ;;  %v153_v27 = vld [vmem:[#allocation13 + $0x18] sm:$0xff] }
  0x5c   :  { %s976_s25 = scalar_lea.vmem [#allocation8], %s597_s28  ;;  %v154_v47 = vld [vmem:[#allocation13 + $0x20] sm:$0xff]  ;;  %v155_v57 = vld [vmem:[#allocation13 + $0x28] sm:$0xff] }
  0x5d   :  { %v720_v5 = vld [vmem:[%s976_s25] sm:$0xff]   ;;  %v721_v6 = vld [vmem:[%s976_s25 + $0x8] sm:$0xff]   ;;  %v722_v7 = vld [vmem:[%s976_s25 + $0x10] sm:$0xff]  }
  0x5e   :  { %661 = vmatprep.subr.bf16.mxu0 %v720_v5  ;;  %693 = vmatprep.subr.bf16.mxu1 %v720_v5  ;;  %v723_v8 = vld [vmem:[%s976_s25 + $0x18] sm:$0xff]   ;;  %v724_v9 = vld [vmem:[%s976_s25 + $0x20] sm:$0xff]   ;;  %v725_v10 = vld [vmem:[%s976_s25 + $0x28] sm:$0xff]  }
  0x5f   :  { %662 = vmatpush3.bf16.msra.mxu0 %v720_v5  ;;  %701 = vmatpush3.bf16.msra.mxu1 %v720_v5  ;;  %v726_v11 = vld [vmem:[%s976_s25 + $0x30] sm:$0xff]   ;;  %v727_v12 = vld [vmem:[%s976_s25 + $0x38] sm:$0xff]   ;;  %v158_v24 = vld [vmem:[#allocation13 + $0x40] sm:$0xff] }
  0x60   :  { %663 = vmatprep.subr.bf16.mxu0 %v721_v6  ;;  %694 = vmatprep.subr.bf16.mxu1 %v721_v6  ;;  %v160_v22 = vld [vmem:[#allocation13 + $0x50] sm:$0xff]  ;;  %v161_v28 = vld [vmem:[#allocation13 + $0x58] sm:$0xff]  ;;  %v159_v34 = vld [vmem:[#allocation13 + $0x48] sm:$0xff] }
  0x61   :  { %v156_v45 = vld [vmem:[#allocation13 + $0x30] sm:$0xff]  ;;  %v162_v48 = vld [vmem:[#allocation13 + $0x60] sm:$0xff]  ;;  %v157_v51 = vld [vmem:[#allocation13 + $0x38] sm:$0xff] }
  0x62   :  { %v164_v46 = vld [vmem:[#allocation13 + $0x70] sm:$0xff]  ;;  %v165_v52 = vld [vmem:[#allocation13 + $0x78] sm:$0xff]  ;;  %v163_v58 = vld [vmem:[#allocation13 + $0x68] sm:$0xff] }
  0x63   :  { %664 = vmatpush3.bf16.msra.mxu0 %v721_v6  ;;  %702 = vmatpush3.bf16.msra.mxu1 %v721_v6 }
  0x64   :  { %665 = vmatprep.subr.bf16.mxu0 %v722_v7  ;;  %695 = vmatprep.subr.bf16.mxu1 %v722_v7 }
  0x67   :  { %666 = vmatpush3.bf16.msra.mxu0 %v722_v7  ;;  %703 = vmatpush3.bf16.msra.mxu1 %v722_v7 }
  0x68   :  { %667 = vmatprep.subr.bf16.mxu0 %v723_v8  ;;  %696 = vmatprep.subr.bf16.mxu1 %v723_v8 }
  0x6b   :  { %668 = vmatpush3.bf16.msra.mxu0 %v723_v8  ;;  %704 = vmatpush3.bf16.msra.mxu1 %v723_v8 }
  0x6c   :  { %669 = vmatprep.subr.bf16.mxu0 %v724_v9  ;;  %697 = vmatprep.subr.bf16.mxu1 %v724_v9 }
  0x6f   :  { %670 = vmatpush3.bf16.msra.mxu0 %v724_v9  ;;  %705 = vmatpush3.bf16.msra.mxu1 %v724_v9 }
  0x70   :  { %671 = vmatprep.subr.bf16.mxu0 %v725_v10  ;;  %698 = vmatprep.subr.bf16.mxu1 %v725_v10 }
  0x73   :  { %672 = vmatpush3.bf16.msra.mxu0 %v725_v10  ;;  %706 = vmatpush3.bf16.msra.mxu1 %v725_v10 }
  0x74   :  { %673 = vmatprep.subr.bf16.mxu0 %v726_v11  ;;  %699 = vmatprep.subr.bf16.mxu1 %v726_v11 }
  0x77   :  { %674 = vmatpush3.bf16.msra.mxu0 %v726_v11  ;;  %707 = vmatpush3.bf16.msra.mxu1 %v726_v11 }
  0x78   :  { %675 = vmatprep.subr.bf16.mxu0 %v727_v12  ;;  %700 = vmatprep.subr.bf16.mxu1 %v727_v12 }
  0x7b   :  { %676 = vmatpush3.bf16.msra.mxu0 %v727_v12  ;;  %708 = vmatpush3.bf16.msra.mxu1 %v727_v12 }
  0x7e   :  { %678 = vmatmul.mubr.bf16.vlgmr.msra.gmra.mrb[0].mxu0 %v118_v15  ;;  %686 = vmatmul.mubr.bf16.vlgmr.msra.gmra.mrb[0].mxu1 %v122_v16 }
  0x7f   :  { %681 = vmatprep.mubr.bf16.mxu0 %v119_v17  ;;  %689 = vmatprep.mubr.bf16.mxu1 %v123_v18 }
  0x86   :  { %682 = vmatmul.mubr.bf16.gmra.mrb[4].mxu0 %v120_v19  ;;  %690 = vmatmul.mubr.bf16.gmra.mrb[4].mxu1 %v124_v20 }
 0x151   :  { %v679_v25 = vpop.f32.mrb[0].mxu0  ;;  %v687_v26 = vpop.f32.mrb[0].mxu1 }
 0x152   :  { %v313_v29 = vadd.f32 %v679_v25, %v152_v21  ;;  %v321_v30 = vadd.f32 %v687_v26, %v160_v22  ;;  %v248_v31 = vpop.f32.mrb[1].mxu0  ;;  %v280_v32 = vpop.f32.mrb[1].mxu1 }
 0x153   :  { %v311_v35 = vadd.f32 %v248_v31, %v150_v23  ;;  %v319_v36 = vadd.f32 %v280_v32, %v158_v24  ;;  %v680_v37 = vpop.f32.mrb[2].mxu0  ;;  %v688_v38 = vpop.f32.mrb[2].mxu1 }
 0x154   :  { %329 = vst [vmem:[#allocation13 + $0x10] sm:$0xff] %v313_v29  ;;  %337 = vst [vmem:[#allocation13 + $0x50] sm:$0xff] %v321_v30  ;;  %v314_v39 = vadd.f32 %v680_v37, %v153_v27  ;;  %v322_v40 = vadd.f32 %v688_v38, %v161_v28  ;;  %v251_v41 = vpop.f32.mrb[3].mxu0  ;;  %v283_v42 = vpop.f32.mrb[3].mxu1 }
 0x155   :  { %327 = vst [vmem:[#allocation13] sm:$0xff] %v311_v35  ;;  %335 = vst [vmem:[#allocation13 + $0x40] sm:$0xff] %v319_v36  ;;  %v312_v43 = vadd.f32 %v251_v41, %v151_v33  ;;  %v320_v44 = vadd.f32 %v283_v42, %v159_v34 }
 0x156   :  { %330 = vst [vmem:[#allocation13 + $0x18] sm:$0xff] %v314_v39  ;;  %338 = vst [vmem:[#allocation13 + $0x58] sm:$0xff] %v322_v40 }
 0x157   :  { %328 = vst [vmem:[#allocation13 + $0x8] sm:$0xff] %v312_v43  ;;  %336 = vst [vmem:[#allocation13 + $0x48] sm:$0xff] %v320_v44 }
 0x159   :  { %v683_v49 = vpop.f32.mrb[4].mxu0  ;;  %v691_v50 = vpop.f32.mrb[4].mxu1 }
 0x15a   :  { %v317_v53 = vadd.f32 %v683_v49, %v156_v45  ;;  %v325_v54 = vadd.f32 %v691_v50, %v164_v46  ;;  %v264_v55 = vpop.f32.mrb[5].mxu0  ;;  %v296_v56 = vpop.f32.mrb[5].mxu1 }
 0x15b   :  { %v315_v59 = vadd.f32 %v264_v55, %v154_v47  ;;  %v323_v60 = vadd.f32 %v296_v56, %v162_v48  ;;  %v684_v61 = vpop.f32.mrb[6].mxu0  ;;  %v692_v62 = vpop.f32.mrb[6].mxu1 }
 0x15c   :  { %333 = vst [vmem:[#allocation13 + $0x30] sm:$0xff] %v317_v53  ;;  %341 = vst [vmem:[#allocation13 + $0x70] sm:$0xff] %v325_v54  ;;  %v318_v63 = vadd.f32 %v684_v61, %v157_v51  ;;  %v326_v0 = vadd.f32 %v692_v62, %v165_v52  ;;  %v267_v1 = vpop.f32.mrb[7].mxu0  ;;  %v299_v2 = vpop.f32.mrb[7].mxu1 }
 0x15d   :  { %331 = vst [vmem:[#allocation13 + $0x20] sm:$0xff] %v315_v59  ;;  %339 = vst [vmem:[#allocation13 + $0x60] sm:$0xff] %v323_v60  ;;  %v316_v3 = vadd.f32 %v267_v1, %v155_v57  ;;  %v324_v4 = vadd.f32 %v299_v2, %v163_v58 }
 0x15e   :  { %334 = vst [vmem:[#allocation13 + $0x38] sm:$0xff] %v318_v63  ;;  %342 = vst [vmem:[#allocation13 + $0x78] sm:$0xff] %v326_v0 }
 0x15f   :  { %332 = vst [vmem:[#allocation13 + $0x28] sm:$0xff] %v316_v3  ;;  %340 = vst [vmem:[#allocation13 + $0x68] sm:$0xff] %v324_v4 }
 0x160 PF:  { %v412_v5 = vld [vmem:[#allocation11 + $0x10] sm:$0xff]  ;;  %v410_v6 = vld [vmem:[#allocation11] sm:$0xff]  ;;  %v413_v7 = vld [vmem:[#allocation11 + $0x18] sm:$0xff]  ;;  %v859_v8 = vmov 0   ;;  %s860_s1 = smov [#allocation13]  }
 0x161   :  { %729 = vset.pattern.permute.xlu1 %v859_v8  ;;  %728 = vset.pattern.permute.xlu0 %v859_v8  ;;  %v428_v9 = vmul.f32 0.75, %v412_v5  ;;  %v426_v10 = vmul.f32 0.75, %v410_v6  ;;  %v411_v11 = vld [vmem:[#allocation11 + $0x8] sm:$0xff]  ;;  %v429_v12 = vmul.f32 0.75, %v413_v7  ;;  %v414_v15 = vld [vmem:[#allocation11 + $0x20] sm:$0xff]  ;;  %v417_v18 = vld [vmem:[#allocation11 + $0x38] sm:$0xff] }
 0x162   :  { %v427_v13 = vmul.f32 0.75, %v411_v11  ;;  %v415_v14 = vld [vmem:[#allocation11 + $0x28] sm:$0xff]  ;;  %v430_v17 = vmul.f32 0.75, %v414_v15  ;;  %v416_v19 = vld [vmem:[#allocation11 + $0x30] sm:$0xff]  ;;  %v433_v20 = vmul.f32 0.75, %v417_v18  ;;  %v418_v23 = vld [vmem:[#allocation11 + $0x40] sm:$0xff] }
 0x163   :  { %454 = vperm.xlu1 %729, %v428_v9   ;;  %444 = vperm.xlu0 %728, %v426_v10   ;;  %v431_v16 = vmul.f32 0.75, %v415_v14  ;;  %v432_v21 = vmul.f32 0.75, %v416_v19  ;;  %v419_v22 = vld [vmem:[#allocation11 + $0x48] sm:$0xff]  ;;  %v434_v25 = vmul.f32 0.75, %v418_v23  ;;  %v421_v26 = vld [vmem:[#allocation11 + $0x58] sm:$0xff]  ;;  %v420_v27 = vld [vmem:[#allocation11 + $0x50] sm:$0xff] }
 0x164   :  { %v435_v24 = vmul.f32 0.75, %v419_v22  ;;  %v437_v28 = vmul.f32 0.75, %v421_v26  ;;  %v436_v29 = vmul.f32 0.75, %v420_v27  ;;  %v423_v30 = vld [vmem:[#allocation11 + $0x68] sm:$0xff]  ;;  %v422_v31 = vld [vmem:[#allocation11 + $0x60] sm:$0xff]  ;;  %v425_v34 = vld [vmem:[#allocation11 + $0x78] sm:$0xff] }
 0x165   :  { %v439_v32 = vmul.f32 0.75, %v423_v30  ;;  %v438_v33 = vmul.f32 0.75, %v422_v31  ;;  %v424_v35 = vld [vmem:[#allocation11 + $0x70] sm:$0xff]  ;;  %v441_v36 = vmul.f32 0.75, %v425_v34  ;;  %v638_v38 = vld [vmem:[#allocation10 + $0x8] sm:$0xff]   ;;  %v607_v39 = vld [vmem:[#allocation10] sm:$0xff]  }
 0x166   :  { %v440_v37 = vmul.f32 0.75, %v424_v35  ;;  %v612_v40 = vunpack.c.l.bf16 %v638_v38  ;;  %v608_v41 = vunpack.c.l.bf16 %v607_v39  ;;  %v396_v42 = vld [vmem:[#allocation13 + $0x10] sm:$0xff]  ;;  %v394_v43 = vld [vmem:[#allocation13] sm:$0xff]  ;;  %v613_v46 = vunpack.c.h.bf16 %v638_v38  ;;  %v397_v53 = vld [vmem:[#allocation13 + $0x18] sm:$0xff]  ;;  %s575_s30 = sshll.u32 %s860_s1, 4  ;;  %s576_s30 = int_to_ptr.vmem [resolvable:$true] %s575_s30 }
 0x167   :  { %459 = vperm.xlu1 %729, %v429_v12   ;;  %449 = vperm.xlu0 %728, %v427_v13   ;;  %v609_v47 = vunpack.c.h.bf16 %v607_v39  ;;  %v639_v48 = vld [vmem:[#allocation10 + $0x10] sm:$0xff]   ;;  %v395_v54 = vld [vmem:[#allocation13 + $0x8] sm:$0xff]  ;;  %v640_v63 = vld [vmem:[#allocation10 + $0x18] sm:$0xff]   ;;  %s820_s7 = scalar_lea.vmem %s576_s30, 2048  ;;  %p825_p10 = scmp.lt.s32.totalorder %s576_s30, %s576_s30 }
 0x168   :  { %v380_v44 = vmul.f32 0.25, %v612_v40  ;;  %v378_v45 = vmul.f32 0.25, %v608_v41  ;;  %v617_v55 = vunpack.c.h.bf16 %v639_v48  ;;  %v616_v56 = vunpack.c.l.bf16 %v639_v48  ;;  %v399_v3 = vld [vmem:[#allocation13 + $0x28] sm:$0xff]  ;;  %v398_v5 = vld [vmem:[#allocation13 + $0x20] sm:$0xff]  ;;  %v401_v15 = vld [vmem:[#allocation13 + $0x38] sm:$0xff]  ;;  %p821_p9 = scmp.ne.s32.totalorder %s576_s30, %s820_s7  ;;  %p826_p11 = scmp.lt.s32.totalorder %s820_s7, %s820_s7 }
 0x169   :  { %v381_v59 = vmul.f32 0.25, %v613_v46  ;;  %v379_v60 = vmul.f32 0.25, %v609_v47  ;;  %v621_v8 = vunpack.c.h.bf16 %v640_v63  ;;  %v620_v9 = vunpack.c.l.bf16 %v640_v63  ;;  %v641_v10 = vld [vmem:[#allocation10 + $0x20] sm:$0xff]   ;;  %v405_v41 = vld [vmem:[#allocation13 + $0x58] sm:$0xff] }
 0x16a   :  { %v383_v2 = vmul.f32 0.25, %v617_v55  ;;  %v382_v4 = vmul.f32 0.25, %v616_v56  ;;  %v624_v18 = vunpack.c.l.bf16 %v641_v10  ;;  %v402_v31 = vld [vmem:[#allocation13 + $0x40] sm:$0xff]  ;;  %v407_v55 = vld [vmem:[#allocation13 + $0x68] sm:$0xff]  ;;  %p827_p12 = por %p826_p11, %p825_p10 }
 0x16b   :  { %469 = vperm.xlu1 %729, %v431_v16   ;;  %464 = vperm.xlu0 %728, %v430_v17   ;;  %v400_v16 = vld [vmem:[#allocation13 + $0x30] sm:$0xff]  ;;  %v625_v17 = vunpack.c.h.bf16 %v641_v10  ;;  %v384_v22 = vmul.f32 0.25, %v620_v9 }
 0x16c   :  { %v386_v30 = vmul.f32 0.25, %v624_v18  ;;  %p828_p13 = pnand %p827_p12, %p821_p9 }
 0x16f   :  { %479 = vperm.xlu1 %729, %v433_v20   ;;  %474 = vperm.xlu0 %728, %v432_v21   ;;  %v385_v21 = vmul.f32 0.25, %v621_v8 }
 0x173   :  { %489 = vperm.xlu1 %729, %v435_v24   ;;  %484 = vperm.xlu0 %728, %v434_v25   ;;  %v642_v25 = vld [vmem:[#allocation10 + $0x28] sm:$0xff]  }
 0x174   :  { %v629_v34 = vunpack.c.h.bf16 %v642_v25  ;;  %v628_v35 = vunpack.c.l.bf16 %v642_v25 }
 0x176   :  { %v389_v47 = vmul.f32 0.25, %v629_v34  ;;  %v388_v48 = vmul.f32 0.25, %v628_v35 }
 0x177   :  { %499 = vperm.xlu1 %729, %v437_v28   ;;  %494 = vperm.xlu0 %728, %v436_v29   ;;  %v387_v28 = vmul.f32 0.25, %v625_v17  ;;  %v403_v29 = vld [vmem:[#allocation13 + $0x48] sm:$0xff] }
 0x17b   :  { %509 = vperm.xlu1 %729, %v439_v32   ;;  %504 = vperm.xlu0 %728, %v438_v33  }
 0x17f   :  { %519 = vperm.xlu1 %729, %v441_v36   ;;  %514 = vperm.xlu0 %728, %v440_v37   ;;  %v643_v36 = vld [vmem:[#allocation10 + $0x30] sm:$0xff]  }
 0x1e2   :  { %v455_v49 = vpop.permute.xlu1 %454  ;;  %v445_v50 = vpop.permute.xlu0 %444 }
 0x1e3   :  { %v524_v51 = vmul.f32 %v455_v49, %v396_v42  ;;  %v522_v52 = vmul.f32 %v445_v50, %v394_v43  ;;  %v404_v42 = vld [vmem:[#allocation13 + $0x50] sm:$0xff]  ;;  %v633_v43 = vunpack.c.h.bf16 %v643_v36 }
 0x1e5   :  { %v540_v57 = vadd.f32 %v524_v51, %v380_v44  ;;  %v538_v58 = vadd.f32 %v522_v52, %v378_v45  ;;  %v632_v44 = vunpack.c.l.bf16 %v643_v36  ;;  %v644_v51 = vld [vmem:[#allocation10 + $0x38] sm:$0xff]  }
 0x1e6   :  { %v460_v61 = vpop.permute.xlu1 %459  ;;  %v450_v62 = vpop.permute.xlu0 %449 }
 0x1e7   :  { %556 = vst [vmem:[#allocation13 + $0x10] sm:$0xff] %v540_v57  ;;  %554 = vst [vmem:[#allocation13] sm:$0xff] %v538_v58  ;;  %v525_v0 = vmul.f32 %v460_v61, %v397_v53  ;;  %v523_v1 = vmul.f32 %v450_v62, %v395_v54  ;;  %v391_v54 = vmul.f32 0.25, %v633_v43  ;;  %v390_v56 = vmul.f32 0.25, %v632_v44  ;;  %v406_v57 = vld [vmem:[#allocation13 + $0x60] sm:$0xff] }
 0x1e8   :  { %v636_v61 = vunpack.c.l.bf16 %v644_v51 }
 0x1e9   :  { %v541_v6 = vadd.f32 %v525_v0, %v381_v59  ;;  %v539_v7 = vadd.f32 %v523_v1, %v379_v60  ;;  %v637_v60 = vunpack.c.h.bf16 %v644_v51 }
 0x1ea   :  { %v470_v11 = vpop.permute.xlu1 %469  ;;  %v465_v12 = vpop.permute.xlu0 %464 }
 0x1eb   :  { %557 = vst [vmem:[#allocation13 + $0x18] sm:$0xff] %v541_v6  ;;  %555 = vst [vmem:[#allocation13 + $0x8] sm:$0xff] %v539_v7  ;;  %v527_v13 = vmul.f32 %v470_v11, %v399_v3  ;;  %v526_v14 = vmul.f32 %v465_v12, %v398_v5  ;;  %v408_v3 = vld [vmem:[#allocation13 + $0x70] sm:$0xff]  ;;  %v393_v6 = vmul.f32 0.25, %v637_v60  ;;  %v392_v7 = vmul.f32 0.25, %v636_v61 }
 0x1ed   :  { %v543_v19 = vadd.f32 %v527_v13, %v383_v2  ;;  %v542_v20 = vadd.f32 %v526_v14, %v382_v4  ;;  %v409_v2 = vld [vmem:[#allocation13 + $0x78] sm:$0xff] }
 0x1ee   :  { %v480_v23 = vpop.permute.xlu1 %479  ;;  %v475_v24 = vpop.permute.xlu0 %474 }
 0x1ef   :  { %559 = vst [vmem:[#allocation13 + $0x28] sm:$0xff] %v543_v19  ;;  %558 = vst [vmem:[#allocation13 + $0x20] sm:$0xff] %v542_v20  ;;  %v529_v26 = vmul.f32 %v480_v23, %v401_v15  ;;  %v528_v27 = vmul.f32 %v475_v24, %v400_v16 }
 0x1f1   :  { %v545_v32 = vadd.f32 %v529_v26, %v385_v21  ;;  %v544_v33 = vadd.f32 %v528_v27, %v384_v22 }
 0x1f2   :  { %v490_v37 = vpop.permute.xlu1 %489  ;;  %v485_v38 = vpop.permute.xlu0 %484 }
 0x1f3   :  { %561 = vst [vmem:[#allocation13 + $0x38] sm:$0xff] %v545_v32  ;;  %560 = vst [vmem:[#allocation13 + $0x30] sm:$0xff] %v544_v33  ;;  %v531_v39 = vmul.f32 %v490_v37, %v403_v29  ;;  %v530_v40 = vmul.f32 %v485_v38, %v402_v31 }
 0x1f5   :  { %v547_v45 = vadd.f32 %v531_v39, %v387_v28  ;;  %v546_v46 = vadd.f32 %v530_v40, %v386_v30 }
 0x1f6   :  { %v500_v49 = vpop.permute.xlu1 %499  ;;  %v495_v50 = vpop.permute.xlu0 %494 }
 0x1f7   :  { %563 = vst [vmem:[#allocation13 + $0x48] sm:$0xff] %v547_v45  ;;  %562 = vst [vmem:[#allocation13 + $0x40] sm:$0xff] %v546_v46  ;;  %v533_v52 = vmul.f32 %v500_v49, %v405_v41  ;;  %v532_v53 = vmul.f32 %v495_v50, %v404_v42 }
 0x1f9   :  { %v549_v58 = vadd.f32 %v533_v52, %v389_v47  ;;  %v548_v59 = vadd.f32 %v532_v53, %v388_v48 }
 0x1fa   :  { %v510_v62 = vpop.permute.xlu1 %509  ;;  %v505_v63 = vpop.permute.xlu0 %504 }
 0x1fb   :  { %565 = vst [vmem:[#allocation13 + $0x58] sm:$0xff] %v549_v58  ;;  %564 = vst [vmem:[#allocation13 + $0x50] sm:$0xff] %v548_v59  ;;  %v535_v0 = vmul.f32 %v510_v62, %v407_v55  ;;  %v534_v1 = vmul.f32 %v505_v63, %v406_v57 }
 0x1fd   :  { %v551_v4 = vadd.f32 %v535_v0, %v391_v54  ;;  %v550_v5 = vadd.f32 %v534_v1, %v390_v56 }
 0x1fe   :  { %v520_v8 = vpop.permute.xlu1 %519  ;;  %v515_v9 = vpop.permute.xlu0 %514 }
 0x1ff   :  { %567 = vst [vmem:[#allocation13 + $0x68] sm:$0xff] %v551_v4  ;;  %566 = vst [vmem:[#allocation13 + $0x60] sm:$0xff] %v550_v5  ;;  %v537_v10 = vmul.f32 %v520_v8, %v409_v2  ;;  %v536_v11 = vmul.f32 %v515_v9, %v408_v3 }
 0x201   :  { %v553_v12 = vadd.f32 %v537_v10, %v393_v6  ;;  %v552_v13 = vadd.f32 %v536_v11, %v392_v7 }
 0x203   :  { %569 = vst [vmem:[#allocation13 + $0x78] sm:$0xff] %v553_v12  ;;  %568 = vst [vmem:[#allocation13 + $0x70] sm:$0xff] %v552_v13 }
 0x204   :  { %831 = shalt.err (!%p828_p13)
}
 0x205   :  { %s832_s11 = scalar_lea.hbm %s1007_s6, 2048 }
 0x206   :  { %p833_p0 = scmp.ne.s32.totalorder %s1007_s6, %s832_s11  ;;  %p836_p1 = scmp.lt.u32.totalorder %s832_s11, %s1007_s6 }
 0x208   :  { %p838_p2 = pnand %p836_p1, %p833_p0 }
 0x20a   :  { %841 = shalt.err (!%p838_p2)
}
 0x20b   :  { %581 = dma.vmem_to_hbm [thread:$0]  %s576_s30, 2048, %s1007_s6, [#allocation7], %s856_s29, %s856_s29, %s857_s2  }
 0x20c   :  { %848 = dma.done.wait [#allocation7], 2048  }
 0x20d   :  { %849 = vsyncadd [#allocation7], 4294965248 }
 0x20e   :  { %585 = vsyncpa [#allocation6], 1 }
 0x20f   :  { %586 = vsyncpa [#allocation9], 1 }
 0x210   :  { %587 = vsyncpa [#allocation12], 1 }
 0x211   :  { %588 = vsyncpa [#allocation7], 1 }

</bundles_post_ra>
